<compile_context>
chip_gen: v7x
topology: tpu7x:2x2x1
jax: 0.10.0
libtpu: 0.0.40
codegen_flags: <defaults>
</compile_context>

<pallas_src>
import functools

import jax
import jax.numpy as jnp
from jax.experimental import pallas as pl
from jax.experimental.pallas import tpu as pltpu


# ---------------------------------------------------------------------------
# Configuration mirroring Net.__init__(hidden_layers, dropout, activ_f)
# ---------------------------------------------------------------------------
HIDDEN_LAYERS = 2          # int(hidden_layers)
DROPOUT_P = 0.25           # dropout
ACTIV_F = "relu"           # activ_f (name of a torch.nn.functional activation)
INPUT_DIM = 16             # self.input = 16
OUT_DIM = 5                # fc1: Linear(self.input, 5)

LANE = 128                 # lane-dense padded width of the output slab
TILE_B = 512               # batch tile; sweep 512-2048 on real workloads


def _round_up(n, m):
    return ((n + m - 1) // m) * m


def _apply_activation(name, h):
    if name == "relu":
        return jnp.maximum(h, 0.0)
    if name == "tanh":
        return jnp.tanh(h)
    if name == "sigmoid":
        return jax.nn.sigmoid(h)
    if name == "gelu":
        return jax.nn.gelu(h)
    # TODO(synk): extend mapping if other torch.nn.functional activations are needed
    raise ValueError(f"unsupported activation: {name}")


# ---------------------------------------------------------------------------
# Kernel
# ---------------------------------------------------------------------------
def _net_kernel(num_hidden, drop_threshold, activ_f, *refs):
    """refs = (x, [bits_0 .. bits_{H-1}], w0, b0, ..., w_fc1, b_fc1, out).

    Weights arrive pre-transposed to (in, out), pre-scaled by 1/(1-p) where a
    dropout precedes them, and the final layer is pre-padded to LANE output
    lanes (padded bias = -1e30 so those lanes vanish in the log_softmax).
    """
    n_bits = num_hidden if drop_threshold is not None else 0
    x_ref = refs[0]
    bits_refs = refs[1:1 + n_bits]
    param_refs = refs[1 + n_bits:-1]
    o_ref = refs[-1]

    if drop_threshold is not None:
        thr = jnp.asarray(drop_threshold, dtype=jnp.uint32)

    x = x_ref[...]                          # bf16 activations for the MXU
    for i in range(num_hidden):
        w = param_refs[2 * i][...]          # bf16 (in, out): no in-kernel transpose
        b = param_refs[2 * i + 1][...]      # f32  (1, out)
        h = jnp.dot(x, w, preferred_element_type=jnp.float32) + b
        h = _apply_activation(activ_f, h)
        if drop_threshold is not None:
            # drop with prob p == P(bits < thr); 1/(1-p) rescale is folded
            # into the next layer's weights host-side.
            keep = bits_refs[i][...] >= thr
            h = jnp.where(keep, h, 0.0)
        x = h.astype(jnp.bfloat16)

    wf = param_refs[2 * num_hidden][...]
    bf = param_refs[2 * num_hidden + 1][...]
    logits = jnp.dot(x, wf, preferred_element_type=jnp.float32) + bf
    # Stable log_softmax; padded lanes have logit ~ -1e30 -> exp underflows to 0.
    m = jnp.max(logits, axis=-1, keepdims=True)
    lse = jnp.log(jnp.sum(jnp.exp(logits - m), axis=-1, keepdims=True)) + m
    o_ref[...] = (logits - lse).astype(o_ref.dtype)


# ---------------------------------------------------------------------------
# Host-side parameter handling
# ---------------------------------------------------------------------------
def init_params(key, hidden_layers=HIDDEN_LAYERS, input_dim=INPUT_DIM, out_dim=OUT_DIM):
    """Deterministic init. Weights in torch.nn.Linear layout (out, in),
    biases (1, out)."""
    params = []
    in_dim = input_dim
    for i in range(hidden_layers):
        o = 2 ** (4 + i)
        key, kw, kb = jax.random.split(key, 3)
        w = jax.random.normal(kw, (o, in_dim), dtype=jnp.float32) * (1.0 / jnp.sqrt(in_dim))
        b = jax.random.normal(kb, (1, o), dtype=jnp.float32) * 0.01
        params.append((w, b))
        in_dim = o
    key, kw, kb = jax.random.split(key, 3)
    w = jax.random.normal(kw, (out_dim, in_dim), dtype=jnp.float32) * (1.0 / jnp.sqrt(in_dim))
    b = jax.random.normal(kb, (1, out_dim), dtype=jnp.float32) * 0.01
    params.append((w, b))
    return params


def prepare_params(params, dropout_p, out_pad=LANE):
    """Host-side prep (free; weights are static):
      - transpose (out, in) -> (in, out) so the kernel does x @ W directly
      - fold the inverted-dropout scale 1/(1-p) into every layer that consumes
        a dropped-out activation (all layers except the first)
      - pad the final layer to `out_pad` output lanes (zero weights, -1e30 bias)
      - cast weights to bf16 for the MXU; biases stay f32
    """
    num_hidden = len(params) - 1
    scale = 1.0 / (1.0 - dropout_p) if (dropout_p > 0.0 and num_hidden > 0) else 1.0
    prepped = []
    for i, (w, b) in enumerate(params):
        wt = jnp.asarray(w, dtype=jnp.float32).T                    # (in, out)
        bb = jnp.asarray(b, dtype=jnp.float32).reshape(1, -1)
        if i > 0:
            wt = wt * scale
        if i == num_hidden:
            out_dim = wt.shape[1]
            wt = jnp.pad(wt, ((0, 0), (0, out_pad - out_dim)))
            bb = jnp.concatenate(
                [bb, jnp.full((1, out_pad - out_dim), -1e30, jnp.float32)], axis=-1)
        prepped.append((wt.astype(jnp.bfloat16), bb))
    return prepped


# ---------------------------------------------------------------------------
# Wrapper
# ---------------------------------------------------------------------------
def net_forward(x, params, dropout_key, *, dropout_p=DROPOUT_P, activ_f=ACTIV_F):
    """x: (batch, 16) float32. Returns (batch, 5) float32 log-probabilities."""
    batch, in_dim = x.shape
    num_hidden = len(params) - 1
    out_dim = params[-1][0].shape[0]

    prepped = prepare_params(params, dropout_p)
    flat_params = []
    for w, b in prepped:
        flat_params.extend([w, b])

    # Batch tiling: x / bits / out stream through double-buffered tiles; the
    # tiny weights & biases stay VMEM-resident (constant index_map).
    tile_b = min(TILE_B, _round_up(batch, 8))
    b_pad = _round_up(batch, tile_b)
    grid = (pl.cdiv(b_pad, tile_b),)

    x_p = jnp.pad(x.astype(jnp.bfloat16), ((0, b_pad - batch), (0, 0)))

    # Dropout randomness generated host-side (on-chip PRNG primitives have no
    # CPU/interpret lowering); each batch tile sees independent bits.
    drop_threshold = None
    bits_inputs = []
    if dropout_p > 0.0 and num_hidden > 0:
        drop_threshold = min(int(round(dropout_p * (1 << 32))), (1 << 32) - 1)
        widths = [params[i][0].shape[0] for i in range(num_hidden)]
        keys = jax.random.split(dropout_key, num_hidden)
        bits_inputs = [
            jax.random.bits(keys[i], (b_pad, widths[i]), dtype=jnp.uint32)
            for i in range(num_hidden)
        ]

    def tile_spec(width):
        return pl.BlockSpec((tile_b, width), lambda i: (i, 0))

    def resident_spec(shape):
        return pl.BlockSpec(shape, lambda i: (0, 0))

    in_specs = [tile_spec(in_dim)]
    in_specs += [tile_spec(bits.shape[1]) for bits in bits_inputs]
    in_specs += [resident_spec(p.shape) for p in flat_params]
    out_specs = pl.BlockSpec((tile_b, LANE), lambda i: (i, 0))

    kernel = functools.partial(_net_kernel, num_hidden, drop_threshold, activ_f)

    out_padded = pl.pallas_call(
        kernel,
        out_shape=jax.ShapeDtypeStruct((b_pad, LANE), jnp.float32),
        grid=grid,
        in_specs=in_specs,
        out_specs=out_specs,
        compiler_params=pltpu.CompilerParams(
            # batch tiles are independent -> shard grid steps across both
            # TensorCores on v7x; harmless on v5e/v6e.
            dimension_semantics=("parallel",),
        ),
    )(x_p, *bits_inputs, *flat_params)

    # Drop batch padding and the lane padding of the final layer.
    return out_padded[:batch, :out_dim]


if __name__ == "__main__":
    key = jax.random.PRNGKey(0)
    key_x, key_p, key_d = jax.random.split(key, 3)

    batch = 8
    x = jax.random.normal(key_x, (batch, INPUT_DIM), dtype=jnp.float32)
    params = init_params(key_p)

    out = net_forward(x, params, key_d)
    out = jax.block_until_ready(out)

    # Sanity checks: shape, finiteness, and log_softmax rows summing to ~1.
    assert out.shape == (batch, OUT_DIM), out.shape
    assert bool(jnp.all(jnp.isfinite(out)))
    row_sums = jnp.sum(jnp.exp(out), axis=-1)
    assert bool(jnp.all(jnp.abs(row_sums - 1.0) < 1e-3)), row_sums

    print("KERNEL_OK")
</pallas_src>

<mosaic_0001>
module attributes {stable_mosaic.version = 11 : i64} {
  func.func @_net_kernel(%arg0: i32, %arg1: memref<8x16xbf16, #tpu.memory_space<vmem>>, %arg2: memref<8x16xi32, #tpu.memory_space<vmem>>, %arg3: memref<8x32xi32, #tpu.memory_space<vmem>>, %arg4: memref<16x16xbf16, #tpu.memory_space<vmem>>, %arg5: memref<1x16xf32, #tpu.memory_space<vmem>>, %arg6: memref<16x32xbf16, #tpu.memory_space<vmem>>, %arg7: memref<1x32xf32, #tpu.memory_space<vmem>>, %arg8: memref<32x128xbf16, #tpu.memory_space<vmem>>, %arg9: memref<1x128xf32, #tpu.memory_space<vmem>>, %arg10: memref<8x128xf32, #tpu.memory_space<vmem>>) attributes {dimension_semantics = [#tpu.dimension_semantics<parallel>], iteration_bounds = array<i64: 1>, scalar_prefetch = 0 : i64, scratch_operands = 0 : i64, tpu.core_type = #tpu.core_type<tc>, window_params = [{transform_indices = @transform_0, window_bounds = array<i64: 8, 16>}, {transform_indices = @transform_1, window_bounds = array<i64: 8, 16>}, {transform_indices = @transform_2, window_bounds = array<i64: 8, 32>}, {pipeline_mode = #tpu.pipeline_mode<synchronous>, transform_indices = @transform_3, window_bounds = array<i64: 16, 16>}, {pipeline_mode = #tpu.pipeline_mode<synchronous>, transform_indices = @transform_4, window_bounds = array<i64: 1, 16>}, {pipeline_mode = #tpu.pipeline_mode<synchronous>, transform_indices = @transform_5, window_bounds = array<i64: 16, 32>}, {pipeline_mode = #tpu.pipeline_mode<synchronous>, transform_indices = @transform_6, window_bounds = array<i64: 1, 32>}, {pipeline_mode = #tpu.pipeline_mode<synchronous>, transform_indices = @transform_7, window_bounds = array<i64: 32, 128>}, {pipeline_mode = #tpu.pipeline_mode<synchronous>, transform_indices = @transform_8, window_bounds = array<i64: 1, 128>}, {transform_indices = @transform_9, window_bounds = array<i64: 8, 128>}]} {
    %c0 = arith.constant 0 : index
    %c0_0 = arith.constant 0 : index
    %0 = vector.load %arg1[%c0, %c0_0] : memref<8x16xbf16, #tpu.memory_space<vmem>>, vector<8x16xbf16>
    %c0_1 = arith.constant 0 : index
    %c0_2 = arith.constant 0 : index
    %1 = vector.load %arg4[%c0_1, %c0_2] : memref<16x16xbf16, #tpu.memory_space<vmem>>, vector<16x16xbf16>
    %c0_3 = arith.constant 0 : index
    %c0_4 = arith.constant 0 : index
    %2 = vector.load %arg5[%c0_3, %c0_4] : memref<1x16xf32, #tpu.memory_space<vmem>>, vector<1x16xf32>
    %cst = arith.constant dense<0.000000e+00> : vector<8x16xf32>
    %3 = tpu.matmul %0, %1, %cst {dimension_numbers = #tpu.dot_dimension_numbers<[1], [0], [0], [1], [0, 0, 1, 1], [], []>} : vector<8x16xbf16>, vector<16x16xbf16>, vector<8x16xf32> -> vector<8x16xf32>
    %4 = vector.broadcast %2 : vector<1x16xf32> to vector<8x16xf32>
    %5 = arith.addf %3, %4 : vector<8x16xf32>
    %cst_5 = arith.constant 0.000000e+00 : f32
    %6 = vector.broadcast %cst_5 : f32 to vector<8x16xf32>
    %7 = arith.maximumf %5, %6 : vector<8x16xf32>
    %c0_6 = arith.constant 0 : index
    %c0_7 = arith.constant 0 : index
    %8 = vector.load %arg2[%c0_6, %c0_7] : memref<8x16xi32, #tpu.memory_space<vmem>>, vector<8x16xi32>
    %c1073741824_i32 = arith.constant 1073741824 : i32
    %9 = vector.broadcast %c1073741824_i32 : i32 to vector<8x16xi32>
    %10 = arith.cmpi uge, %8, %9 : vector<8x16xi32>
    %cst_8 = arith.constant 0.000000e+00 : f32
    %11 = vector.broadcast %cst_8 : f32 to vector<8x16xf32>
    %12 = arith.select %10, %7, %11 : vector<8x16xi1>, vector<8x16xf32>
    %13 = arith.truncf %12 : vector<8x16xf32> to vector<8x16xbf16>
    %c0_9 = arith.constant 0 : index
    %c0_10 = arith.constant 0 : index
    %14 = vector.load %arg6[%c0_9, %c0_10] : memref<16x32xbf16, #tpu.memory_space<vmem>>, vector<16x32xbf16>
    %c0_11 = arith.constant 0 : index
    %c0_12 = arith.constant 0 : index
    %15 = vector.load %arg7[%c0_11, %c0_12] : memref<1x32xf32, #tpu.memory_space<vmem>>, vector<1x32xf32>
    %cst_13 = arith.constant dense<0.000000e+00> : vector<8x32xf32>
    %16 = tpu.matmul %13, %14, %cst_13 {dimension_numbers = #tpu.dot_dimension_numbers<[1], [0], [0], [1], [0, 0, 1, 1], [], []>} : vector<8x16xbf16>, vector<16x32xbf16>, vector<8x32xf32> -> vector<8x32xf32>
    %17 = vector.broadcast %15 : vector<1x32xf32> to vector<8x32xf32>
    %18 = arith.addf %16, %17 : vector<8x32xf32>
    %cst_14 = arith.constant 0.000000e+00 : f32
    %19 = vector.broadcast %cst_14 : f32 to vector<8x32xf32>
    %20 = arith.maximumf %18, %19 : vector<8x32xf32>
    %c0_15 = arith.constant 0 : index
    %c0_16 = arith.constant 0 : index
    %21 = vector.load %arg3[%c0_15, %c0_16] : memref<8x32xi32, #tpu.memory_space<vmem>>, vector<8x32xi32>
    %c1073741824_i32_17 = arith.constant 1073741824 : i32
    %22 = vector.broadcast %c1073741824_i32_17 : i32 to vector<8x32xi32>
    %23 = arith.cmpi uge, %21, %22 : vector<8x32xi32>
    %cst_18 = arith.constant 0.000000e+00 : f32
    %24 = vector.broadcast %cst_18 : f32 to vector<8x32xf32>
    %25 = arith.select %23, %20, %24 : vector<8x32xi1>, vector<8x32xf32>
    %26 = arith.truncf %25 : vector<8x32xf32> to vector<8x32xbf16>
    %c0_19 = arith.constant 0 : index
    %c0_20 = arith.constant 0 : index
    %27 = vector.load %arg8[%c0_19, %c0_20] : memref<32x128xbf16, #tpu.memory_space<vmem>>, vector<32x128xbf16>
    %c0_21 = arith.constant 0 : index
    %c0_22 = arith.constant 0 : index
    %28 = vector.load %arg9[%c0_21, %c0_22] : memref<1x128xf32, #tpu.memory_space<vmem>>, vector<1x128xf32>
    %cst_23 = arith.constant dense<0.000000e+00> : vector<8x128xf32>
    %29 = tpu.matmul %26, %27, %cst_23 {dimension_numbers = #tpu.dot_dimension_numbers<[1], [0], [0], [1], [0, 0, 1, 1], [], []>} : vector<8x32xbf16>, vector<32x128xbf16>, vector<8x128xf32> -> vector<8x128xf32>
    %30 = vector.broadcast %28 : vector<1x128xf32> to vector<8x128xf32>
    %31 = arith.addf %29, %30 : vector<8x128xf32>
    %cst_24 = arith.constant dense<0xFF800000> : vector<8xf32>
    %32 = vector.multi_reduction <maximumf>, %31, %cst_24 [1] : vector<8x128xf32> to vector<8xf32>
    %33 = vector.shape_cast %32 : vector<8xf32> to vector<8x1xf32>
    %34 = vector.broadcast %33 : vector<8x1xf32> to vector<8x128xf32>
    %35 = arith.subf %31, %34 : vector<8x128xf32>
    %36 = math.exp %35 : vector<8x128xf32>
    %cst_25 = arith.constant dense<0.000000e+00> : vector<8xf32>
    %37 = vector.multi_reduction <add>, %36, %cst_25 [1] : vector<8x128xf32> to vector<8xf32>
    %38 = vector.shape_cast %37 : vector<8xf32> to vector<8x1xf32>
    %39 = math.log %38 : vector<8x1xf32>
    %40 = arith.addf %39, %33 : vector<8x1xf32>
    %41 = vector.broadcast %40 : vector<8x1xf32> to vector<8x128xf32>
    %42 = arith.subf %31, %41 : vector<8x128xf32>
    %c0_26 = arith.constant 0 : index
    %c0_27 = arith.constant 0 : index
    %43 = vector.load %arg10[%c0_26, %c0_27] : memref<8x128xf32, #tpu.memory_space<vmem>>, vector<8x128xf32>
    tpu.vector_store %arg10[%c0_26, %c0_27], %42 {strides = array<i32>} : memref<8x128xf32, #tpu.memory_space<vmem>>, vector<8x128xf32>,
    return
  }
  func.func @transform_0(%arg0: i32) -> (i32, i32) {
    %c0_i32 = arith.constant 0 : i32
    %c0_i32_0 = arith.constant 0 : i32
    return %arg0, %c0_i32 : i32, i32
  }
  func.func @transform_1(%arg0: i32) -> (i32, i32) {
    %c0_i32 = arith.constant 0 : i32
    %c0_i32_0 = arith.constant 0 : i32
    return %arg0, %c0_i32 : i32, i32
  }
  func.func @transform_2(%arg0: i32) -> (i32, i32) {
    %c0_i32 = arith.constant 0 : i32
    %c0_i32_0 = arith.constant 0 : i32
    return %arg0, %c0_i32 : i32, i32
  }
  func.func @transform_3(%arg0: i32) -> (i32, i32) {
    %c0_i32 = arith.constant 0 : i32
    %c0_i32_0 = arith.constant 0 : i32
    %c0_i32_1 = arith.constant 0 : i32
    return %c0_i32, %c0_i32_0 : i32, i32
  }
  func.func @transform_4(%arg0: i32) -> (i32, i32) {
    %c0_i32 = arith.constant 0 : i32
    %c0_i32_0 = arith.constant 0 : i32
    %c0_i32_1 = arith.constant 0 : i32
    return %c0_i32, %c0_i32_0 : i32, i32
  }
  func.func @transform_5(%arg0: i32) -> (i32, i32) {
    %c0_i32 = arith.constant 0 : i32
    %c0_i32_0 = arith.constant 0 : i32
    %c0_i32_1 = arith.constant 0 : i32
    return %c0_i32, %c0_i32_0 : i32, i32
  }
  func.func @transform_6(%arg0: i32) -> (i32, i32) {
    %c0_i32 = arith.constant 0 : i32
    %c0_i32_0 = arith.constant 0 : i32
    %c0_i32_1 = arith.constant 0 : i32
    return %c0_i32, %c0_i32_0 : i32, i32
  }
  func.func @transform_7(%arg0: i32) -> (i32, i32) {
    %c0_i32 = arith.constant 0 : i32
    %c0_i32_0 = arith.constant 0 : i32
    %c0_i32_1 = arith.constant 0 : i32
    return %c0_i32, %c0_i32_0 : i32, i32
  }
  func.func @transform_8(%arg0: i32) -> (i32, i32) {
    %c0_i32 = arith.constant 0 : i32
    %c0_i32_0 = arith.constant 0 : i32
    %c0_i32_1 = arith.constant 0 : i32
    return %c0_i32, %c0_i32_0 : i32, i32
  }
  func.func @transform_9(%arg0: i32) -> (i32, i32) {
    %c0_i32 = arith.constant 0 : i32
    %c0_i32_0 = arith.constant 0 : i32
    return %arg0, %c0_i32 : i32, i32
  }
}

</mosaic_0001>

<bundles_post_ra>
// kernel: tpu_custom_call.1
= control target key start
LH: loop header
LB: loop body
LE: loop exit
PB: predicated region body
PF: predicated region fallthrough
CT: control target
= control target key end

     0   :  { %14 = vsyncpa [#allocation3], 0  ;;  %s625_s0 = inlined_call_operand.hbm [shape: bf16[8,16], index: 0, kind: input, shape index: {}]   ;;  %s626_s1 = inlined_call_operand.hbm [shape: u32[8,16], index: 1, kind: input, shape index: {}]   ;;  %s627_s2 = inlined_call_operand.hbm [shape: u32[8,32], index: 2, kind: input, shape index: {}]   ;;  %s628_s3 = inlined_call_operand.vmem [shape: bf16[16,16], index: 3, kind: input, shape index: {}]   ;;  %s629_s4 = inlined_call_operand.vmem [shape: f32[1,16], index: 4, kind: input, shape index: {}]   ;;  %s630_s5 = inlined_call_operand.hbm [shape: bf16[16,32], index: 5, kind: input, shape index: {}]   ;;  %s631_s6 = inlined_call_operand.vmem [shape: f32[1,32], index: 6, kind: input, shape index: {}]   ;;  %s632_s7 = inlined_call_operand.vmem [shape: bf16[32,128], index: 7, kind: input, shape index: {}]   ;;  %s633_s8 = inlined_call_operand.vmem [shape: f32[1,128], index: 8, kind: input, shape index: {}]   ;;  %s634_s9 = inlined_call_operand.hbm [shape: f32[8,128], index: 9, kind: output, shape index: {}]  }
   0x1   :  { %15 = vsyncpa [#allocation6], 0 }
   0x2   :  { %16 = vsyncpa [#allocation9], 0 }
   0x3   :  { %17 = vsyncpa [#allocation4], 0  ;;  %s479_s30 = smov [#allocation5]   ;;  %s480_s11 = smov [#allocation2]  }
   0x4   :  { %s34_s10 = sshll.u32 %s479_s30, 4  ;;  %s24_s12 = sshll.u32 %s480_s11, 4  ;;  %s35_s10 = int_to_ptr.vmem [resolvable:$true] %s34_s10  ;;  %s25_s12 = int_to_ptr.vmem [resolvable:$true] %s24_s12 }
   0x5   :  { %s361_s15 = scalar_lea.hbm %s626_s1, 128 }
   0x6   :  { %p362_p0 = scmp.ne.s32.totalorder %s626_s1, %s361_s15  ;;  %p365_p1 = scmp.lt.u32.totalorder %s361_s15, %s626_s1 }
   0x8   :  { %p367_p2 = pnand %p365_p1, %p362_p0 }
   0xa   :  { %370 = shalt.err (!%p367_p2)
}
   0xb   :  { %s371_s20 = scalar_lea.vmem %s35_s10, 128  ;;  %p376_p4 = scmp.lt.s32.totalorder %s35_s10, %s35_s10 }
   0xc   :  { %p372_p3 = scmp.ne.s32.totalorder %s35_s10, %s371_s20  ;;  %p377_p5 = scmp.lt.s32.totalorder %s371_s20, %s371_s20 }
   0xe   :  { %p378_p6 = por %p377_p5, %p376_p4 }
  0x10   :  { %p379_p7 = pnand %p378_p6, %p372_p3 }
  0x12   :  { %382 = shalt.err (!%p379_p7)
}
  0x13   :  { %37 = dma.hbm_to_vmem [thread:$0]  %s626_s1, 128, %s35_s10, [#allocation6]  }
  0x14   :  { %s383_s25 = scalar_lea.hbm %s625_s0, 64 }
  0x15   :  { %p384_p8 = scmp.ne.s32.totalorder %s625_s0, %s383_s25  ;;  %p387_p9 = scmp.lt.u32.totalorder %s383_s25, %s625_s0 }
  0x17   :  { %p389_p10 = pnand %p387_p9, %p384_p8 }
  0x19   :  { %392 = shalt.err (!%p389_p10)
}
  0x1a   :  { %s393_s30 = scalar_lea.vmem %s25_s12, 64  ;;  %p398_p12 = scmp.lt.s32.totalorder %s25_s12, %s25_s12 }
  0x1b   :  { %p394_p11 = scmp.ne.s32.totalorder %s25_s12, %s393_s30  ;;  %p399_p13 = scmp.lt.s32.totalorder %s393_s30, %s393_s30 }
  0x1d   :  { %p400_p0 = por %p399_p13, %p398_p12 }
  0x1f   :  { %p401_p1 = pnand %p400_p0, %p394_p11 }
  0x21   :  { %404 = shalt.err (!%p401_p1)
}
  0x22   :  { %27 = dma.hbm_to_vmem [thread:$0]  %s625_s0, 64, %s25_s12, [#allocation3]  }
  0x23   :  { %s481_s11 = smov [#allocation7]   ;;  %s482_s14 = smov [#allocation8]  }
  0x24   :  { %s44_s13 = sshll.u32 %s481_s11, 4  ;;  %s57_s15 = sshll.u32 %s482_s14, 4  ;;  %s45_s13 = int_to_ptr.vmem [resolvable:$true] %s44_s13  ;;  %s562_s15 = int_to_ptr.vmem [resolvable:$true] %s57_s15 }
  0x25   :  { %s405_s18 = scalar_lea.hbm %s627_s2, 128 }
  0x26   :  { %p406_p2 = scmp.ne.s32.totalorder %s627_s2, %s405_s18  ;;  %p409_p3 = scmp.lt.u32.totalorder %s405_s18, %s627_s2 }
  0x28   :  { %p411_p4 = pnand %p409_p3, %p406_p2 }
  0x2a   :  { %414 = shalt.err (!%p411_p4)
}
  0x2b   :  { %s415_s0 = scalar_lea.vmem %s45_s13, 128  ;;  %p420_p6 = scmp.lt.s32.totalorder %s45_s13, %s45_s13 }
  0x2c   :  { %p416_p5 = scmp.ne.s32.totalorder %s45_s13, %s415_s0  ;;  %p421_p7 = scmp.lt.s32.totalorder %s415_s0, %s415_s0 }
  0x2e   :  { %p422_p8 = por %p421_p7, %p420_p6 }
  0x30   :  { %p423_p9 = pnand %p422_p8, %p416_p5 }
  0x32   :  { %426 = shalt.err (!%p423_p9)
}
  0x33   :  { %47 = dma.hbm_to_vmem [thread:$0]  %s627_s2, 128, %s45_s13, [#allocation6]  }
  0x34   :  { %s427_s26 = scalar_lea.hbm %s630_s5, 128 }
  0x35   :  { %p428_p10 = scmp.ne.s32.totalorder %s630_s5, %s427_s26  ;;  %p431_p11 = scmp.lt.u32.totalorder %s427_s26, %s630_s5 }
  0x37   :  { %p433_p12 = pnand %p431_p11, %p428_p10 }
  0x39   :  { %436 = shalt.err (!%p433_p12)
}
  0x3a   :  { %s437_s1 = scalar_lea.vmem %s562_s15, 128  ;;  %p442_p0 = scmp.lt.s32.totalorder %s562_s15, %s562_s15 }
  0x3b   :  { %p438_p13 = scmp.ne.s32.totalorder %s562_s15, %s437_s1  ;;  %p443_p1 = scmp.lt.s32.totalorder %s437_s1, %s437_s1 }
  0x3d   :  { %p444_p2 = por %p443_p1, %p442_p0 }
  0x3f   :  { %p445_p3 = pnand %p444_p2, %p438_p13 }
  0x41   :  { %448 = shalt.err (!%p445_p3)
}
  0x42   :  { %s483_s2 = smov 64   ;;  %s484_s10 = smov 4  }
  0x43   :  { %63 = dma.hbm_to_vmem [thread:$0]  %s630_s5, 128, %s562_s15, [#allocation9], %s483_s2, %s483_s2, %s484_s10  }
  0x44   :  { %471 = dma.done.wait [#allocation3], 64  }
  0x45   :  { %472 = vsyncadd [#allocation3], 4294967232 }
  0x46   :  { %473 = dma.done.wait [#allocation6], 256  }
  0x47   :  { %474 = vsyncadd [#allocation6], 4294967040 }
  0x48   :  { %475 = dma.done.wait [#allocation9], 128  }
  0x49   :  { %476 = vsyncadd [#allocation9], 4294967168  ;;  %v485_v0 = vmov 0.0   ;;  %vm486_vm0 = vmmov 0   ;;  %v353_v1 = vld [vmem:[%s628_s3] sm:$0xff]   ;;  %vm99_vm1 = vcmask 130048  }
  0x4a   :  { %324 = vmatprep.subr.bf16.mxu0 %v485_v0  ;;  %326 = vmatprep.mubr.msk.bf16.mxu0 %vm486_vm0, %v485_v0  ;;  %v83_v2 = vld [vmem:[#allocation2] sm:$0xf]  ;;  %v354_v3 = vld [vmem:[#allocation8] sm:$0xff]   ;;  %v307_v4 = vld [vmem:[%s629_s4] ss:$0 sm:$0xff]  ;;  %vm234_vm4 = vcmask 261120  }
  0x4b   :  { %330 = vmatprep.subr.bf16.mxu1 %v485_v0  ;;  %332 = vmatprep.mubr.msk.bf16.mxu1 %vm486_vm0, %v485_v0  ;;  %v144_v5 = vld [vmem:[#allocation5] sm:$0xff]  ;;  %v356_v15 = vld [vmem:[%s632_s7 + $0x8] sm:$0xff]  }
  0x4c   :  { %325 = vmatpush3.bf16.msra.mxu0 %v353_v1  ;;  %331 = vmatpush3.bf16.msra.mxu1 %v354_v3  ;;  %vm145_vm2 = vcmp.ge.u32.totalorder %v144_v5, 1073741824  ;;  %v355_v14 = vld [vmem:[%s632_s7] sm:$0xff]  }
  0x4d   :  { %336 = vmatprep.subr.bf16.mxu0 %v485_v0  ;;  %v310_v16 = vld [vmem:[%s631_s6] ss:$0 sm:$0xff]  ;;  %v207_v17 = vld [vmem:[#allocation7] sm:$0xff]  ;;  %s487_s6 = smov [#allocation10]  }
  0x4e   :  { %vm208_vm3 = vcmp.ge.u32.totalorder %v207_v17, 1073741824  ;;  %v313_v26 = vld [vmem:[%s633_s8] ss:$0 sm:$0xff]  ;;  %s296_s7 = sshll.u32 %s487_s6, 4  ;;  %s297_s7 = int_to_ptr.vmem [resolvable:$true] %s296_s7 }
  0x4f   :  { %327 = vmatmul.mubr.msk.bf16.vlgmr.msra.gmra.mrb[0].mxu0 %vm99_vm1, %v83_v2  ;;  %s449_s8 = scalar_lea.vmem %s297_s7, 128  ;;  %p454_p5 = scmp.lt.s32.totalorder %s297_s7, %s297_s7 }
  0x50   :  { %340 = vmatprep.mubr.msk.bf16.mxu0 %vm486_vm0, %v485_v0  ;;  %337 = vmatpush3.bf16.msra.mxu0 %v355_v14  ;;  %p450_p4 = scmp.ne.s32.totalorder %s297_s7, %s449_s8  ;;  %p455_p6 = scmp.lt.s32.totalorder %s449_s8, %s449_s8 }
  0x51   :  { %338 = vmatprep.subr.bf16.mxu0 %v485_v0 }
  0x52   :  { %p456_p7 = por %p455_p6, %p454_p5 }
  0x54   :  { %339 = vmatpush3.bf16.msra.mxu0 %v356_v15  ;;  %p457_p8 = pnand %p456_p7, %p450_p4 }
 0x122   :  { %v137_v6 = vpop.f32.mrb[0].mxu0 }
 0x123   :  { %v138_v7 = vadd.f32 %v307_v4, %v137_v6  ;;  %v328_v8 = vpop.f32.mrb[1].mxu0 }
 0x124   :  { %v140_v9 = vpop.f32.mrb[2].mxu0 }
 0x125   :  { %v143_v10 = vmax.f32 %v138_v7, 0.0  ;;  %v329_v11 = vpop.f32.mrb[3].mxu0 }
 0x127   :  { %v146_v12 = vsel %vm145_vm2, %v143_v10, 0.0 }
 0x128   :  { %v147_v13 = vpack.c.bf16 %v146_v12, %v146_v12 }
 0x12a   :  { %333 = vmatmul.mubr.msk.bf16.vlgmr.msra.gmra.mrb[0].mxu1 %vm99_vm1, %v147_v13 }
 0x1fd   :  { %v200_v18 = vpop.f32.mrb[0].mxu1 }
 0x1fe   :  { %v201_v19 = vadd.f32 %v310_v16, %v200_v18  ;;  %v334_v20 = vpop.f32.mrb[1].mxu1 }
 0x1ff   :  { %v203_v21 = vpop.f32.mrb[2].mxu1 }
 0x200   :  { %v206_v22 = vmax.f32 %v201_v19, 0.0  ;;  %v335_v23 = vpop.f32.mrb[3].mxu1 }
 0x202   :  { %v209_v24 = vsel %vm208_vm3, %v206_v22, 0.0 }
 0x203   :  { %v210_v25 = vpack.c.bf16 %v209_v24, %v209_v24 }
 0x205   :  { %341 = vmatmul.mubr.msk.bf16.vlgmr.msra.gmra.mrb[4].mxu0 %vm234_vm4, %v210_v25 }
 0x2d8   :  { %v272_v27 = vpop.f32.mrb[4].mxu0 }
 0x2d9   :  { %v273_v28 = vadd.f32 %v313_v26, %v272_v27  ;;  %v342_v29 = vpop.f32.mrb[5].mxu0 }
 0x2da   :  { %v275_v30 = vpop.f32.mrb[6].mxu0 }
 0x2db   :  { %278 = vmax.xlane.f32.xlu0 %v273_v28  ;;  %v343_v31 = vpop.f32.mrb[7].mxu0 }
 0x368   :  { %v279_v32 = vpop.xlane.xlu0 %278 }
 0x369   :  { %v280_v33 = vsub.f32 %v273_v28, %v279_v32 }
 0x36b   :  { %v281_v34 = vmul.f32 1.442695, %v280_v33 }
 0x36d   :  { %357 = vpow2.f32 %v281_v34 }
 0x377   :  { %v358_v35 = vpop.eup %357 }
 0x378   :  { %283 = vadd.xlane.f32.xlu0 %v358_v35 }
 0x405   :  { %v284_v36 = vpop.xlane.xlu0 %283 }
 0x406   :  { %359 = vlog2.f32 %v284_v36 }
 0x410   :  { %v360_v37 = vpop.eup %359 }
 0x411   :  { %v286_v38 = vmul.f32 0.6931472, %v360_v37 }
 0x413   :  { %v287_v39 = vadd.f32 %v286_v38, %v279_v32 }
 0x415   :  { %v288_v40 = vsub.f32 %v273_v28, %v287_v39 }
 0x417   :  { %289 = vst [vmem:[#allocation10] sm:$0xff] %v288_v40 }
 0x418   :  { %460 = shalt.err (!%p457_p8)
}
 0x419   :  { %s461_s23 = scalar_lea.hbm %s634_s9, 128 }
 0x41a   :  { %p462_p9 = scmp.ne.s32.totalorder %s634_s9, %s461_s23  ;;  %p465_p10 = scmp.lt.u32.totalorder %s461_s23, %s634_s9 }
 0x41c   :  { %p467_p11 = pnand %p465_p10, %p462_p9 }
 0x41e   :  { %470 = shalt.err (!%p467_p11)
}
 0x41f   :  { %299 = dma.vmem_to_hbm [thread:$0]  %s297_s7, 128, %s634_s9, [#allocation4]  }
 0x420   :  { %477 = dma.done.wait [#allocation4], 128  }
 0x421   :  { %478 = vsyncadd [#allocation4], 4294967168 }
 0x422   :  { %303 = vsyncpa [#allocation3], 1 }
 0x423   :  { %304 = vsyncpa [#allocation6], 1 }
 0x424   :  { %305 = vsyncpa [#allocation9], 1 }
 0x425   :  { %306 = vsyncpa [#allocation4], 1 }

</bundles_post_ra>
